<compile_context>
chip_gen: v7x
topology: tpu7x:2x2x1
jax: 0.10.0
libtpu: 0.0.40
codegen_flags: <defaults>
</compile_context>

<pallas_src>
import random

import jax
import jax.numpy as jnp
from jax.experimental import pallas as pl
from jax.experimental.pallas import tpu as pltpu

# Deterministic "f" parameters (synthetic — module __init__ carries no weights).
GAMMA = 1.25
BETA = -0.5
P_APPLY = 0.75  # the module's `p`

TARGET_TILE_BYTES = 4 * 1024 * 1024   # ~4 MiB/block → ~16 MiB live double-buffered
VMEM_LIMIT_BYTES = 32 * 1024 * 1024   # safe on v5e / v6e / v7x


def _apply_f_kernel(x_ref, o_ref):
    """Branchless elementwise f(x) = GAMMA*x + BETA on one VMEM tile."""
    # --- this is `f(x)`; swap in any elementwise transform here ---
    x = x_ref[...]
    y = x.astype(jnp.float32) * GAMMA + BETA   # f32 constants / f32 compute
    o_ref[...] = y.astype(o_ref.dtype)


def _apply_f(x: jax.Array) -> jax.Array:
    """Tiled, pipelined elementwise kernel over an arbitrarily shaped float tensor."""
    orig_shape = x.shape
    total = x.size
    itemsize = jnp.dtype(x.dtype).itemsize
    # Sublane packing granularity: 8 rows (f32), 16 (bf16/f16), 32 (int8/fp8).
    sub = 8 * max(1, 4 // itemsize)

    # Fast path: pick a lane width (multiple of 128) that exactly divides the
    # flattened size — reshape is free, no pad, no output slice.
    lane = None
    for cand in (512, 1024, 256, 128):
        if total % cand == 0:
            lane = cand
            break

    if lane is None:
        # TODO(synk): ragged fallback (size not a multiple of 128) still pays a
        # pad + slice pass; a masked partial-tail kernel would avoid it.
        lane = 512
        chunk = sub * lane
        padded = pl.cdiv(total, chunk) * chunk
        flat = jnp.pad(x.reshape(-1), (0, padded - total))
        rows = padded // lane
        x2d = flat.reshape(rows, lane)
        needs_slice = True
    else:
        rows = total // lane
        x2d = x.reshape(rows, lane)
        needs_slice = False

    # Byte-budgeted tile rows, rounded to the sublane-packing multiple.
    tile_rows = (TARGET_TILE_BYTES // (lane * itemsize)) // sub * sub
    tile_rows = max(sub, tile_rows)
    # If the whole slab is smaller than one tile, use a full-extent block
    # (allowed regardless of divisibility since it equals the array dim).
    tile_rows = min(tile_rows, rows)

    grid = (pl.cdiv(rows, tile_rows),)  # partial last block is masked by Pallas

    out2d = pl.pallas_call(
        _apply_f_kernel,
        out_shape=jax.ShapeDtypeStruct((rows, lane), x.dtype),
        grid=grid,
        in_specs=[pl.BlockSpec((tile_rows, lane), lambda i: (i, 0))],
        out_specs=pl.BlockSpec((tile_rows, lane), lambda i: (i, 0)),
        compiler_params=pltpu.CompilerParams(
            dimension_semantics=("parallel",),
            vmem_limit_bytes=VMEM_LIMIT_BYTES,
        ),
    )(x2d)

    out = out2d.reshape(-1)
    if needs_slice:
        out = out[:total]
    return out.reshape(orig_shape)


def prob_transform(x: jax.Array, key: jax.Array | None = None, p: float = P_APPLY) -> jax.Array:
    """Pallas implementation of ProbTransform.forward.

    The PyTorch module flips its coin at the Python level (`random.random() < p`),
    so the decision is hoisted host-side here too: with probability p the Pallas
    kernel computes f(x); otherwise `x` itself is returned — no kernel launch,
    no lax.cond output buffer, zero HBM traffic on the identity path.
    """
    if key is not None:
        apply_f = bool(jax.random.uniform(key, ()) < p)   # deterministic, host-side
    else:
        apply_f = random.random() < p                     # mirrors the module exactly
    if apply_f:
        return _apply_f(x)
    return x


if __name__ == "__main__":
    key = jax.random.PRNGKey(0)
    kx, kcoin = jax.random.split(key)

    # Small shape consistent with an image-style module: NCHW = (2, 4, 16, 16).
    # total = 2048 → lane = 512, rows = 4: hits the no-pad fast path.
    x = jax.random.normal(kx, (2, 4, 16, 16), dtype=jnp.float32)

    out = prob_transform(x, kcoin, p=P_APPLY)
    out = jax.block_until_ready(out)

    assert out.shape == x.shape and out.dtype == x.dtype

    # Reference check: result must equal either f(x) or x exactly, matching the
    # coin flip drawn from the same key/op inside prob_transform.
    applied = bool(jax.random.uniform(kcoin, ()) < P_APPLY)
    ref = x * GAMMA + BETA if applied else x
    assert jnp.allclose(out, ref, atol=1e-6), "mismatch vs reference branch"

    print("KERNEL_OK")
</pallas_src>

<mosaic_0001>
module attributes {stable_mosaic.version = 11 : i64} {
  func.func @_apply_f_kernel(%arg0: i32, %arg1: memref<4x512xf32, #tpu.memory_space<vmem>>, %arg2: memref<4x512xf32, #tpu.memory_space<vmem>>) attributes {dimension_semantics = [#tpu.dimension_semantics<parallel>], iteration_bounds = array<i64: 1>, scalar_prefetch = 0 : i64, scratch_operands = 0 : i64, tpu.core_type = #tpu.core_type<tc>, window_params = [{transform_indices = @transform_0, window_bounds = array<i64: 4, 512>}, {transform_indices = @transform_1, window_bounds = array<i64: 4, 512>}]} {
    %c0 = arith.constant 0 : index
    %c0_0 = arith.constant 0 : index
    %0 = vector.load %arg1[%c0, %c0_0] : memref<4x512xf32, #tpu.memory_space<vmem>>, vector<4x512xf32>
    %cst = arith.constant 1.250000e+00 : f32
    %1 = vector.broadcast %cst : f32 to vector<4x512xf32>
    %2 = arith.mulf %0, %1 : vector<4x512xf32>
    %cst_1 = arith.constant -5.000000e-01 : f32
    %3 = vector.broadcast %cst_1 : f32 to vector<4x512xf32>
    %4 = arith.addf %2, %3 : vector<4x512xf32>
    %c0_2 = arith.constant 0 : index
    %c0_3 = arith.constant 0 : index
    %5 = vector.load %arg2[%c0_2, %c0_3] : memref<4x512xf32, #tpu.memory_space<vmem>>, vector<4x512xf32>
    tpu.vector_store %arg2[%c0_2, %c0_3], %4 {strides = array<i32>} : memref<4x512xf32, #tpu.memory_space<vmem>>, vector<4x512xf32>,
    return
  }
  func.func @transform_0(%arg0: i32) -> (i32, i32) {
    %c0_i32 = arith.constant 0 : i32
    %c0_i32_0 = arith.constant 0 : i32
    return %arg0, %c0_i32 : i32, i32
  }
  func.func @transform_1(%arg0: i32) -> (i32, i32) {
    %c0_i32 = arith.constant 0 : i32
    %c0_i32_0 = arith.constant 0 : i32
    return %arg0, %c0_i32 : i32, i32
  }
}

</mosaic_0001>

<bundles_post_ra>
// kernel: tpu_custom_call.1
= control target key start
LH: loop header
LB: loop body
LE: loop exit
PB: predicated region body
PF: predicated region fallthrough
CT: control target
= control target key end

     0   :  { %6 = vsyncpa [#allocation3], 0  ;;  %s130_s0 = inlined_call_operand.hbm [shape: f32[4,512], index: 0, kind: input, shape index: {}]   ;;  %s131_s1 = inlined_call_operand.hbm [shape: f32[4,512], index: 1, kind: output, shape index: {}]  }
   0x1   :  { %7 = vsyncpa [#allocation4], 0  ;;  %s94_s6 = smov [#allocation2]   ;;  %s46_s10 = scalar_lea.hbm %s130_s0, 256 }
   0x2   :  { %s14_s7 = sshll.u32 %s94_s6, 4  ;;  %p47_p0 = scmp.ne.s32.totalorder %s130_s0, %s46_s10  ;;  %s15_s7 = int_to_ptr.vmem [resolvable:$true] %s14_s7 }
   0x3   :  { %p50_p1 = scmp.lt.u32.totalorder %s46_s10, %s130_s0 }
   0x5   :  { %p52_p2 = pnand %p50_p1, %p47_p0 }
   0x7   :  { %55 = shalt.err (!%p52_p2)
}
   0x8   :  { %s56_s15 = scalar_lea.vmem %s15_s7, 256  ;;  %p61_p4 = scmp.lt.s32.totalorder %s15_s7, %s15_s7 }
   0x9   :  { %p57_p3 = scmp.ne.s32.totalorder %s15_s7, %s56_s15  ;;  %p62_p5 = scmp.lt.s32.totalorder %s56_s15, %s56_s15 }
   0xb   :  { %p63_p6 = por %p62_p5, %p61_p4 }
   0xd   :  { %p64_p7 = pnand %p63_p6, %p57_p3 }
   0xf   :  { %67 = shalt.err (!%p64_p7)
}
  0x10   :  { %17 = dma.hbm_to_vmem [thread:$0]  %s130_s0, 256, %s15_s7, [#allocation3]  }
  0x11   :  { %90 = dma.done.wait [#allocation3], 256  }
  0x12   :  { %91 = vsyncadd [#allocation3], 4294967040  ;;  %v21_v0 = vld [vmem:[#allocation2] sm:$0xff]  ;;  %v22_v1 = vld [vmem:[#allocation2 + $0x8] sm:$0xff]  ;;  %s95_s18 = smov [#allocation5]  }
  0x13   :  { %s35_s19 = sshll.u32 %s95_s18, 4  ;;  %v23_v2 = vmul.f32 1.25, %v21_v0  ;;  %v24_v3 = vmul.f32 1.25, %v22_v1  ;;  %s36_s19 = int_to_ptr.vmem [resolvable:$true] %s35_s19 }
  0x14   :  { %s68_s20 = scalar_lea.vmem %s36_s19, 256  ;;  %p73_p9 = scmp.lt.s32.totalorder %s36_s19, %s36_s19 }
  0x15   :  { %v25_v4 = vadd.f32 -0.5, %v23_v2  ;;  %v26_v5 = vadd.f32 -0.5, %v24_v3  ;;  %p69_p8 = scmp.ne.s32.totalorder %s36_s19, %s68_s20  ;;  %p74_p10 = scmp.lt.s32.totalorder %s68_s20, %s68_s20 }
  0x17   :  { %27 = vst [vmem:[#allocation5] sm:$0xff] %v25_v4  ;;  %28 = vst [vmem:[#allocation5 + $0x8] sm:$0xff] %v26_v5  ;;  %p75_p11 = por %p74_p10, %p73_p9 }
  0x19   :  { %p76_p12 = pnand %p75_p11, %p69_p8 }
  0x1b   :  { %79 = shalt.err (!%p76_p12)
}
  0x1c   :  { %s80_s22 = scalar_lea.hbm %s131_s1, 256 }
  0x1d   :  { %p81_p13 = scmp.ne.s32.totalorder %s131_s1, %s80_s22  ;;  %p84_p0 = scmp.lt.u32.totalorder %s80_s22, %s131_s1 }
  0x1f   :  { %p86_p1 = pnand %p84_p0, %p81_p13 }
  0x21   :  { %89 = shalt.err (!%p86_p1)
}
  0x22   :  { %38 = dma.vmem_to_hbm [thread:$0]  %s36_s19, 256, %s131_s1, [#allocation4]  }
  0x23   :  { %92 = dma.done.wait [#allocation4], 256  }
  0x24   :  { %93 = vsyncadd [#allocation4], 4294967040 }
  0x25   :  { %42 = vsyncpa [#allocation3], 1 }
  0x26   :  { %43 = vsyncpa [#allocation4], 1 }

</bundles_post_ra>
